<compile_context>
chip_gen: v5e
topology: v5e:2x2
jax: 0.10.0
libtpu: 0.0.40
codegen_flags: <defaults>
</compile_context>

<pallas_src>
import functools

import jax
import jax.numpy as jnp
from jax.experimental import pallas as pl
from jax.experimental.pallas import tpu as pltpu


def _round_up(x, m):
    return (x + m - 1) // m * m


# --------------------------------------------------------------------------
# Pallas kernels
# --------------------------------------------------------------------------
def _matmul_bias_kernel(x_ref, w_ref, b_ref, o_ref, *, apply_relu):
    # bf16 operands -> f32 accumulation on the MXU; f32 epilogue on the VPU.
    acc = jnp.dot(x_ref[...], w_ref[...], preferred_element_type=jnp.float32)
    acc = acc + b_ref[...]
    if apply_relu:
        acc = jnp.maximum(acc, 0.0)
    o_ref[...] = acc


def _matmul_bias_res_kernel(x_ref, w_ref, b_ref, r_ref, o_ref, *, inner_relu):
    # Fused residual: relu( maybe_relu(x @ w + b) + shortcut )
    acc = jnp.dot(x_ref[...], w_ref[...], preferred_element_type=jnp.float32)
    acc = acc + b_ref[...]
    if inner_relu:
        acc = jnp.maximum(acc, 0.0)
    o_ref[...] = jnp.maximum(acc + r_ref[...], 0.0)


def _max9_kernel(x0, x1, x2, x3, x4, x5, x6, x7, x8, o_ref):
    m = jnp.maximum(x0[...], x1[...])
    m = jnp.maximum(m, x2[...])
    m = jnp.maximum(m, x3[...])
    m = jnp.maximum(m, x4[...])
    m = jnp.maximum(m, x5[...])
    m = jnp.maximum(m, x6[...])
    m = jnp.maximum(m, x7[...])
    m = jnp.maximum(m, x8[...])
    o_ref[...] = m


# --------------------------------------------------------------------------
# Pallas wrappers
# --------------------------------------------------------------------------
def matmul_bias_act(x, w_scaled, bias, *, relu, residual=None):
    """out[:M,:N] = epi((x @ w_scaled) + bias).

    If `residual` is given: out = relu(maybe_relu(x@w + bias) + residual)
    where the inner relu is controlled by `relu`.
    Patches/weights go through the MXU in bf16; accumulation/epilogue in f32.
    """
    M, K = x.shape
    _, N = w_scaled.shape

    TM = min(256, _round_up(M, 16))       # adaptive M tile (bf16 sublane pack)
    Mp = _round_up(M, TM)
    Kp = _round_up(K, 128)
    Np = _round_up(N, 128)
    TN = Np if Np <= 256 else 256         # N tiles so v7x's 2nd core gets work

    xp = x.astype(jnp.bfloat16)
    if (Mp, Kp) != (M, K):
        xp = jnp.pad(xp, ((0, Mp - M), (0, Kp - K)))
    wp = w_scaled.astype(jnp.bfloat16)
    if (Kp, Np) != (K, N):
        wp = jnp.pad(wp, ((0, Kp - K), (0, Np - N)))
    bp = bias.reshape(1, N).astype(jnp.float32)
    if Np != N:
        bp = jnp.pad(bp, ((0, 0), (0, Np - N)))

    in_specs = [
        pl.BlockSpec((TM, Kp), lambda i, j: (i, 0)),
        pl.BlockSpec((Kp, TN), lambda i, j: (0, j)),
        pl.BlockSpec((1, TN), lambda i, j: (0, j)),
    ]
    args = [xp, wp, bp]

    if residual is None:
        kern = functools.partial(_matmul_bias_kernel, apply_relu=relu)
    else:
        rp = residual.astype(jnp.float32)
        if (Mp, Np) != (M, N):
            rp = jnp.pad(rp, ((0, Mp - M), (0, Np - N)))
        in_specs.append(pl.BlockSpec((TM, TN), lambda i, j: (i, j)))
        args.append(rp)
        kern = functools.partial(_matmul_bias_res_kernel, inner_relu=relu)

    out = pl.pallas_call(
        kern,
        out_shape=jax.ShapeDtypeStruct((Mp, Np), jnp.float32),
        grid=(Mp // TM, Np // TN),
        in_specs=in_specs,
        out_specs=pl.BlockSpec((TM, TN), lambda i, j: (i, j)),
        compiler_params=pltpu.CompilerParams(
            dimension_semantics=("parallel", "parallel")),
    )(*args)
    if (Mp, Np) != (M, N):
        out = out[:M, :N]
    return out


def maxpool2d_3x3_s2_p1(x):
    """nn.MaxPool2d(kernel_size=3, stride=2, padding=1) on NHWC input.

    The 9 shifted window views are passed as 9 separate inputs; the kernel
    does pairwise max (no sentinel-filled (9, Mp, Cp) stack in HBM).
    """
    N, H, W, C = x.shape
    k, s, p = 3, 2, 1
    Ho = (H + 2 * p - k) // s + 1
    Wo = (W + 2 * p - k) // s + 1
    xp = jnp.pad(x.astype(jnp.float32), ((0, 0), (p, p), (p, p), (0, 0)),
                 constant_values=-1e30)

    M = N * Ho * Wo
    TM = min(256, _round_up(M, 8))
    Mp = _round_up(M, TM)
    Cp = _round_up(C, 128)

    views = []
    for i in range(k):
        for j in range(k):
            v = xp[:, i:i + s * Ho:s, j:j + s * Wo:s, :].reshape(M, C)
            if (Mp, Cp) != (M, C):
                v = jnp.pad(v, ((0, Mp - M), (0, Cp - C)))
            views.append(v)

    out = pl.pallas_call(
        _max9_kernel,
        out_shape=jax.ShapeDtypeStruct((Mp, Cp), jnp.float32),
        grid=(Mp // TM,),
        in_specs=[pl.BlockSpec((TM, Cp), lambda i: (i, 0)) for _ in range(9)],
        out_specs=pl.BlockSpec((TM, Cp), lambda i: (i, 0)),
        compiler_params=pltpu.CompilerParams(dimension_semantics=("parallel",)),
    )(*views)
    return out[:M, :C].reshape(N, Ho, Wo, C)


# --------------------------------------------------------------------------
# Conv / ConvTranspose glue (im2col, dilation, padding) + fused Pallas matmul
# --------------------------------------------------------------------------
def _im2col(x, kh, kw, stride, pad):
    N, H, W, C = x.shape
    Ho = (H + 2 * pad - kh) // stride + 1
    Wo = (W + 2 * pad - kw) // stride + 1
    xp = jnp.pad(x, ((0, 0), (pad, pad), (pad, pad), (0, 0)))
    cols = []
    for i in range(kh):
        for j in range(kw):
            cols.append(xp[:, i:i + stride * Ho:stride, j:j + stride * Wo:stride, :])
    patches = jnp.stack(cols, axis=3)  # (N, Ho, Wo, kh*kw, C)
    return patches.reshape(N * Ho * Wo, kh * kw * C), (N, Ho, Wo)


def conv2d_bn_act(x, w_oihw, scale, bias, stride, pad, relu, residual=None):
    """Conv2d(bias=False) + eval BatchNorm (scale folded into weight) +
    optional ReLU (+ optional fused residual-add-ReLU).  NHWC."""
    co, ci, kh, kw = w_oihw.shape
    w_mat = jnp.transpose(w_oihw, (2, 3, 1, 0)).reshape(kh * kw * ci, co)
    w_mat = w_mat * scale.reshape(1, co)          # fold BN scale (f32, host)
    patches, (N, Ho, Wo) = _im2col(x, kh, kw, stride, pad)
    res2 = None if residual is None else residual.reshape(N * Ho * Wo, co)
    out = matmul_bias_act(patches, w_mat, bias, relu=relu, residual=res2)
    return out.reshape(N, Ho, Wo, co)


def conv_transpose2d_bn_act(x, w_iohw, scale, bias, stride, pad, out_pad, relu):
    """ConvTranspose2d(bias=False) + eval BatchNorm + optional ReLU. NHWC.

    Implemented as input dilation + asymmetric padding + stride-1 conv with
    the spatially-flipped, channel-transposed weight.
    """
    ci, co, kh, kw = w_iohw.shape
    N, H, W, C = x.shape
    Hd = (H - 1) * stride + 1
    Wd = (W - 1) * stride + 1
    xd = jnp.zeros((N, Hd, Wd, C), x.dtype).at[:, ::stride, ::stride, :].set(x)
    pad_t = kh - 1 - pad
    pad_b = kh - 1 - pad + out_pad
    pad_l = kw - 1 - pad
    pad_r = kw - 1 - pad + out_pad
    xpad = jnp.pad(xd, ((0, 0), (pad_t, pad_b), (pad_l, pad_r), (0, 0)))
    w_conv = jnp.transpose(jnp.flip(w_iohw, axis=(2, 3)), (1, 0, 2, 3))  # OIHW
    return conv2d_bn_act(xpad, w_conv, scale, bias, 1, 0, relu)


# --------------------------------------------------------------------------
# Deterministic parameter construction (mirrors _ResNetAE.__init__)
# --------------------------------------------------------------------------
def _conv_w(key, co, ci, kh, kw):
    std = (2.0 / (ci * kh * kw)) ** 0.5
    return std * jax.random.normal(key, (co, ci, kh, kw), jnp.float32)


def _convT_w(key, ci, co, kh, kw):
    std = (2.0 / (ci * kh * kw)) ** 0.5
    return std * jax.random.normal(key, (ci, co, kh, kw), jnp.float32)


def _bn(key, c, eps=1e-5):
    k1, k2, k3, k4 = jax.random.split(key, 4)
    gamma = 1.0 + 0.1 * jax.random.normal(k1, (c,), jnp.float32)
    beta = 0.1 * jax.random.normal(k2, (c,), jnp.float32)
    mean = 0.1 * jax.random.normal(k3, (c,), jnp.float32)
    var = 1.0 + 0.1 * jax.random.uniform(k4, (c,), jnp.float32)
    s = gamma / jnp.sqrt(var + eps)
    b = beta - mean * s
    return s, b


def _bottleneck_params(key, cin, cmid, stride, has_ds):
    # downblock = standard torchxrayvision Bottleneck, expansion = 4
    EXP = 4
    ks = jax.random.split(key, 8)
    p = {
        "stride": stride,
        "w1": _conv_w(ks[0], cmid, cin, 1, 1), "bn1": _bn(ks[1], cmid),
        "w2": _conv_w(ks[2], cmid, cmid, 3, 3), "bn2": _bn(ks[3], cmid),
        "w3": _conv_w(ks[4], cmid * EXP, cmid, 1, 1), "bn3": _bn(ks[5], cmid * EXP),
        "ds_w": None, "ds_bn": None,
    }
    if has_ds:
        p["ds_w"] = _conv_w(ks[6], cmid * EXP, cin, 1, 1)
        p["ds_bn"] = _bn(ks[7], cmid * EXP)
    return p


def _bottleneck_forward(p, x):
    out = conv2d_bn_act(x, p["w1"], *p["bn1"], 1, 0, True)
    out = conv2d_bn_act(out, p["w2"], *p["bn2"], p["stride"], 1, True)
    if p["ds_w"] is not None:
        shortcut = conv2d_bn_act(x, p["ds_w"], *p["ds_bn"], p["stride"], 0, False)
    else:
        shortcut = x
    # Fused: relu(conv3_bn3(out) + shortcut)   (no inner ReLU in Bottleneck)
    return conv2d_bn_act(out, p["w3"], *p["bn3"], 1, 0, False, residual=shortcut)


def _deconv_params(key, cin, cmid, expansion, stride, has_up):
    ks = jax.random.split(key, 8)
    p = {
        "stride": stride,
        "w1": _conv_w(ks[0], cmid, cin, 1, 1), "bn1": _bn(ks[1], cmid),
        "bn2": _bn(ks[3], cmid),
        "w3": _conv_w(ks[4], cmid * expansion, cmid, 1, 1),
        "bn3": _bn(ks[5], cmid * expansion),
        "up_w": None, "up_bn": None,
    }
    if stride == 1:
        p["w2"] = _conv_w(ks[2], cmid, cmid, 3, 3)          # Conv2d 3x3 pad 1
    else:
        p["w2"] = _convT_w(ks[2], cmid, cmid, 3, 3)         # ConvTranspose2d
    if has_up:
        p["up_w"] = _convT_w(ks[6], cin, cmid * expansion, 1, 1)
        p["up_bn"] = _bn(ks[7], cmid * expansion)
    return p


def _deconv_forward(p, x):
    out = conv2d_bn_act(x, p["w1"], *p["bn1"], 1, 0, True)
    if p["stride"] == 1:
        out = conv2d_bn_act(out, p["w2"], *p["bn2"], 1, 1, True)
    else:
        out = conv_transpose2d_bn_act(out, p["w2"], *p["bn2"], p["stride"], 1, 1, True)
    if p["up_w"] is not None:
        shortcut = conv_transpose2d_bn_act(x, p["up_w"], *p["up_bn"], p["stride"], 0, 1, False)
    else:
        shortcut = x
    # Fused: relu(relu(conv3_bn3(out)) + shortcut)   (DeconvBottleneck has inner ReLU)
    return conv2d_bn_act(out, p["w3"], *p["bn3"], 1, 0, True, residual=shortcut)


def build_params(key, num_layers=(1, 1, 1, 1), n_classes=1):
    keys = iter(jax.random.split(key, 64))
    params = {}
    in_channels = [64]  # mutable cell mirroring self.in_channels

    params["conv1_w"] = _conv_w(next(keys), 64, 1, 7, 7)
    params["bn1"] = _bn(next(keys), 64)

    def make_downlayer(init_ch, num_layer, stride):
        blocks = []
        has_ds = (stride != 1) or (in_channels[0] != init_ch * 4)
        blocks.append(_bottleneck_params(next(keys), in_channels[0], init_ch, stride, has_ds))
        in_channels[0] = init_ch * 4
        for _ in range(1, num_layer):
            blocks.append(_bottleneck_params(next(keys), in_channels[0], init_ch, 1, False))
        return blocks

    params["layer1"] = make_downlayer(64, num_layers[0], 1)
    params["layer2"] = make_downlayer(128, num_layers[1], 2)
    params["layer3"] = make_downlayer(256, num_layers[2], 2)
    params["layer4"] = make_downlayer(128, num_layers[3], 6)

    def make_up_block(init_ch, num_layer, stride):
        blocks = []
        has_up = (stride != 1) or (in_channels[0] != init_ch * 2)
        for _ in range(1, num_layer):
            blocks.append(_deconv_params(next(keys), in_channels[0], init_ch, 4, 1, False))
        blocks.append(_deconv_params(next(keys), in_channels[0], init_ch, 2, stride, has_up))
        in_channels[0] = init_ch * 2
        return blocks

    params["uplayer1"] = make_up_block(128, num_layers[3], 6)
    params["uplayer2"] = make_up_block(64, num_layers[2], 2)
    params["uplayer3"] = make_up_block(32, num_layers[1], 2)
    params["uplayer4"] = make_up_block(16, num_layers[0], 2)

    # uplayer_top = DeconvBottleneck(in_channels, 64, expansion=1, stride=2, upsample)
    params["uplayer_top"] = _deconv_params(next(keys), in_channels[0], 64, 1, 2, True)
    params["conv1_1_w"] = _convT_w(next(keys), 64, n_classes, 1, 1)
    return params


# --------------------------------------------------------------------------
# Full forward pass (encode + decode), PyTorch NCHW at the boundary
# --------------------------------------------------------------------------
def resnet_ae_forward(params, x_nchw):
    x = jnp.transpose(x_nchw.astype(jnp.float32), (0, 2, 3, 1))  # -> NHWC

    # encode
    out = conv2d_bn_act(x, params["conv1_w"], *params["bn1"], 2, 3, True)
    out = maxpool2d_3x3_s2_p1(out)
    for name in ("layer1", "layer2", "layer3", "layer4"):
        for blk in params[name]:
            out = _bottleneck_forward(blk, out)
    z = out

    # decode
    for name in ("uplayer1", "uplayer2", "uplayer3", "uplayer4"):
        for blk in params[name]:
            out = _deconv_forward(blk, out)
    out = _deconv_forward(params["uplayer_top"], out)

    # conv1_1: ConvTranspose2d(64, n_classes, k=1, s=1), output_size = x.size()
    w = params["conv1_1_w"]  # (64, n_classes, 1, 1)
    nc = w.shape[1]
    ones = jnp.ones((nc,), jnp.float32)
    zeros = jnp.zeros((nc,), jnp.float32)
    out = conv_transpose2d_bn_act(out, w, ones, zeros, 1, 0, 0, False)
    assert out.shape[1:3] == x.shape[1:3]  # output_size constraint of ConvTranspose2d

    return {
        "z": jnp.transpose(z, (0, 3, 1, 2)),      # back to NCHW
        "out": jnp.transpose(out, (0, 3, 1, 2)),  # back to NCHW
    }


if __name__ == "__main__":
    key = jax.random.PRNGKey(0)
    pkey, xkey = jax.random.split(key)
    params = build_params(pkey, num_layers=(1, 1, 1, 1), n_classes=1)

    # Smallest spatial size (32) consistent with the encoder/decoder stride
    # pattern so that conv1_1's output_size == x.size() holds exactly.
    x = jax.random.normal(xkey, (2, 1, 32, 32), jnp.float32)

    ret = resnet_ae_forward(params, x)
    jax.block_until_ready(ret)

    assert ret["z"].shape == (2, 512, 1, 1), ret["z"].shape
    assert ret["out"].shape == (2, 1, 32, 32), ret["out"].shape
    assert jnp.all(jnp.isfinite(ret["z"])) and jnp.all(jnp.isfinite(ret["out"]))
    print("KERNEL_OK")
</pallas_src>

<mosaic_0001>
module attributes {stable_mosaic.version = 11 : i64} {
  func.func @_matmul_bias_kernel(%arg0: i32, %arg1: i32, %arg2: memref<256x128xbf16, #tpu.memory_space<vmem>>, %arg3: memref<128x128xbf16, #tpu.memory_space<vmem>>, %arg4: memref<1x128xf32, #tpu.memory_space<vmem>>, %arg5: memref<256x128xf32, #tpu.memory_space<vmem>>) attributes {dimension_semantics = [#tpu.dimension_semantics<parallel>, #tpu.dimension_semantics<parallel>], iteration_bounds = array<i64: 2, 1>, scalar_prefetch = 0 : i64, scratch_operands = 0 : i64, tpu.core_type = #tpu.core_type<tc>, window_params = [{transform_indices = @transform_0, window_bounds = array<i64: 256, 128>}, {transform_indices = @transform_1, window_bounds = array<i64: 128, 128>}, {transform_indices = @transform_2, window_bounds = array<i64: 1, 128>}, {transform_indices = @transform_3, window_bounds = array<i64: 256, 128>}]} {
    %c0 = arith.constant 0 : index
    %c0_0 = arith.constant 0 : index
    %0 = vector.load %arg2[%c0, %c0_0] : memref<256x128xbf16, #tpu.memory_space<vmem>>, vector<256x128xbf16>
    %c0_1 = arith.constant 0 : index
    %c0_2 = arith.constant 0 : index
    %1 = vector.load %arg3[%c0_1, %c0_2] : memref<128x128xbf16, #tpu.memory_space<vmem>>, vector<128x128xbf16>
    %cst = arith.constant dense<0.000000e+00> : vector<256x128xf32>
    %2 = tpu.matmul %0, %1, %cst {dimension_numbers = #tpu.dot_dimension_numbers<[1], [0], [0], [1], [0, 0, 1, 1], [], []>} : vector<256x128xbf16>, vector<128x128xbf16>, vector<256x128xf32> -> vector<256x128xf32>
    %c0_3 = arith.constant 0 : index
    %c0_4 = arith.constant 0 : index
    %3 = vector.load %arg4[%c0_3, %c0_4] : memref<1x128xf32, #tpu.memory_space<vmem>>, vector<1x128xf32>
    %4 = vector.broadcast %3 : vector<1x128xf32> to vector<256x128xf32>
    %5 = arith.addf %2, %4 : vector<256x128xf32>
    %cst_5 = arith.constant 0.000000e+00 : f32
    %6 = vector.broadcast %cst_5 : f32 to vector<256x128xf32>
    %7 = arith.maximumf %5, %6 : vector<256x128xf32>
    %c0_6 = arith.constant 0 : index
    %c0_7 = arith.constant 0 : index
    %8 = vector.load %arg5[%c0_6, %c0_7] : memref<256x128xf32, #tpu.memory_space<vmem>>, vector<256x128xf32>
    tpu.vector_store %arg5[%c0_6, %c0_7], %7 {strides = array<i32>} : memref<256x128xf32, #tpu.memory_space<vmem>>, vector<256x128xf32>,
    return
  }
  func.func @transform_0(%arg0: i32, %arg1: i32) -> (i32, i32) {
    %c0_i32 = arith.constant 0 : i32
    %c0_i32_0 = arith.constant 0 : i32
    return %arg0, %c0_i32 : i32, i32
  }
  func.func @transform_1(%arg0: i32, %arg1: i32) -> (i32, i32) {
    %c0_i32 = arith.constant 0 : i32
    %c0_i32_0 = arith.constant 0 : i32
    return %c0_i32, %arg1 : i32, i32
  }
  func.func @transform_2(%arg0: i32, %arg1: i32) -> (i32, i32) {
    %c0_i32 = arith.constant 0 : i32
    %c0_i32_0 = arith.constant 0 : i32
    return %c0_i32, %arg1 : i32, i32
  }
  func.func @transform_3(%arg0: i32, %arg1: i32) -> (i32, i32) {
    %c0_i32 = arith.constant 0 : i32
    return %arg0, %arg1 : i32, i32
  }
}

</mosaic_0001>

<bundles_post_ra>
// kernel: tpu_custom_call.1
= control target key start
LH: loop header
LB: loop body
LE: loop exit
PB: predicated region body
PF: predicated region fallthrough
CT: control target
= control target key end

     0   :  { %s1379_s0 = inlined_call_operand.hbm [shape: bf16[512,128], index: 0, kind: input, shape index: {}]   ;;  %s1380_s1 = inlined_call_operand.hbm [shape: bf16[128,128], index: 1, kind: input, shape index: {}]   ;;  %s1381_s2 = inlined_call_operand.vmem [shape: f32[1,128], index: 2, kind: input, shape index: {}]   ;;  %s1382_s3 = inlined_call_operand.hbm [shape: f32[512,128], index: 3, kind: output, shape index: {}]  }
   0x1   :  { %1384 = sst [smem:[#allocation11_spill]] %s1380_s1 }
   0x2   :  { %8 = vsyncpa [#allocation3], 0 }
   0x3   :  { %10 = vsyncpa [#allocation3 + $0x1], 0 }
   0x4   :  { %11 = vsyncpa [#allocation6], 0 }
   0x5   :  { %12 = vsyncpa [#allocation4], 0 }
   0x6   :  { %14 = vsyncpa [#allocation4 + $0x1], 0  ;;  %s1133_s12 = smov 0   ;;  %s1135_s13 = smov 0  }
   0x7   :  { %s1137_s14 = smov 0   ;;  %s1139_s15 = smov 0  }
   0x8   :  { %s1141_s16 = smov 0   ;;  %s1143_s17 = smov 0  }
   0x9 LB: > { %s718_s18 = sadd.s32 4294967295, %s1106_s17   ;;  %s719_s19 = sadd.s32 4294967294, %s1106_s17   ;;  %s1106_s17 = sphi %s1143_s17, %s20_s17   ;;  %s1102_s16 = sphi %s1141_s16, %s1398_s16   ;;  %s1098_s15 = sphi %s1139_s15, %s1397_s15   ;;  %s1094_s14 = sphi %s1137_s14, %s1396_s14   ;;  %s1090_s13 = sphi %s1135_s13, %s1395_s13   ;;  %s1086_s12 = sphi %s1133_s12, %s1394_s12  }
   0xa   : > { %p52_p0 = scmp.ne.s32.totalorder %s1090_s13, %s1086_s12  ;;  %p1167_p1 = scmp.eq.s32.totalorder %s718_s18, 0 }
   0xb   : > { %p1171_p2 = scmp.eq.s32.totalorder %s718_s18, 1  ;;  %p136_p3 = scmp.eq.s32.totalorder %s719_s19, 1 }
   0xc   : > { %p1177_p4 = por %p1167_p1, %p52_p0  ;;  %p720_p5 = scmp.ge.s32.totalorder %s1106_s17, 1 }
   0xd   : > { %p1182_p6 = por %p136_p3, %p52_p0  ;;  %p143_p7 = scmp.lt.s32.totalorder %s1106_s17, 3 }
   0xe   : > { %s1389_s1 = sld [smem:[#allocation11_spill]]  ;;  %s1108_s28 = smov [#allocation5]  }
   0xf   : > { %p1190_p8 = pnand %p720_p5, %p143_p7  ;;  %s158_s29 = sshll.u32 %s1108_s28, 4  ;;  %s159_s29 = int_to_ptr.vmem [resolvable:$true] %s158_s29 }
  0x10   : > { %p723_p11 = scmp.ge.s32.totalorder %s1106_s17, 2  ;;  %s1383_s30 = smov 64  }
  0x11   : > { %p890_p9 = pneg %p1190_p8  ;;  %s1110_s4 = smov 4  }
  0x12   : > { %s32_s5 = sadd.s32 1, %s1102_s16  ;;  %s39_s6 = sadd.s32 1, %s1094_s14 }
  0x13   : > { %p891_p10 = pnand %p890_p9, %p1167_p1  ;;  %p34_p12 = scmp.ge.s32.totalorder %s32_s5, 2 }
  0x14   : > { %s156_s26 = sshll.u32 %s1389_s1, 4  ;;  %p46_p13 = scmp.ne.s32.totalorder %s1094_s14, %s1090_s13  ;;  %s157_s26 = int_to_ptr.hbm [resolvable:$true] %s156_s26 }
  0x15   : > { %893 = dma.hbm_to_vmem [thread:$0]  (!%p891_p10), %s157_s26, 1024, %s159_s29, [#allocation6], %s1383_s30, %s1383_s30, %s1110_s4  }
  0x16   : > { %p47_p0 = scmp.eq.s32.totalorder %s1106_s17, 0  ;;  %s1400_s5 = smov (%p34_p12, %s32_s5), 0 }
  0x17   : > { %p1215_p5 = por %p1171_p2, %p46_p13  ;;  %s36_s9 = ssub.s32 %s1102_s16, %s1400_s5 }
  0x18   : > { %p1209_p3 = por %p47_p0, %p46_p13  ;;  %p903_p7 = scmp.lt.s32.totalorder %s1106_s17, 2 }
  0x19   : > { %p37_p9 = scmp.eq.s32.totalorder %s36_s9, 0  ;;  %s178_s10 = sand.u32 1, %s1094_s14  }
  0x1a   : > { %s724_s11 = sshll.u32 %s178_s10, 7  ;;  %s832_s19 = sshll.u32 %s1102_s16, 7 }
  0x1b   : > { %s1224_s18 = scalar_select %p37_p9, %s1094_s14, %s39_s6  }
  0x1c   : > { %s187_s26 = scalar_lea.hbm %s1379_s0, %s832_s19  ;;  %s182_s28 = scalar_lea.vmem [#allocation2], %s724_s11 }
  0x1d   : > { %s190_s29 = sshll.u32 %s182_s28, 4  ;;  %s188_s21 = sshll.u32 %s187_s26, 4  ;;  %s191_s29 = int_to_ptr.vmem [resolvable:$true] %s190_s29  ;;  %s189_s21 = int_to_ptr.hbm [resolvable:$true] %s188_s21 }
  0x1e   : > { %p895_p2 = pnand %p903_p7, %p1209_p3  ;;  %s179_s30 = scalar_lea.sflag [#allocation3], %s178_s10 }
  0x1f   : > { %s1393_s1 = smov 64   ;;  %202 = sbr.rel (%p1190_p8) target bundleno = 269 (0x10d), region = 32 }
  0x20   : > { %897 = dma.hbm_to_vmem [thread:$0]  (!%p895_p2), %s189_s21, 2048, %s191_s29, %s179_s30, %s1393_s1, %s1393_s1, %s1110_s4  }
  0x21   : > { %s1238_s6 = sand.u32 (!%p1190_p8), 1, %s1090_s13  }
  0x22   : > { %s728_s9 = sshll.u32 (!%p1190_p8), %s1238_s6, 7  ;;  %s205_s11 = scalar_lea.sflag (!%p1190_p8), [#allocation3], %s1238_s6 }
  0x23   : > { %s1242_s19 = scalar_lea.vmem (!%p1190_p8), [#allocation2], %s728_s9 }
  0x24   : > { %1073 = dma.done.wait (%p1177_p4), %s205_s11, 2048  }
  0x25   : > { %1075 = vsyncadd (%p1177_p4), %s205_s11, 4294965248 }
  0x26   : > { %1077 = dma.done.wait (%p1167_p1), [#allocation6], 1024  }
  0x27   : > { %1079 = vsyncadd (%p1167_p1), [#allocation6], 4294966272  ;;  %v856_v0 = vld [vmem:[#allocation5 + $0x38] sm:$0xff]  ;;  %v855_v1 = vld [vmem:[#allocation5 + $0x30] sm:$0xff]  ;;  %s730_s22 = sshll.u32 %s1238_s6, 8  ;;  %s857_s30 = sshll.u32 %s1098_s15, 8 }
  0x28   : > { %441 = vmatpush.bf16.msra.mxu0 %v856_v0  ;;  %858 = vmatpush.bf16.msra.mxu1 %v856_v0  ;;  %v854_v2 = vld [vmem:[#allocation5 + $0x28] sm:$0xff]  ;;  %v853_v3 = vld [vmem:[#allocation5 + $0x20] sm:$0xff]  ;;  %v852_v4 = vld [vmem:[#allocation5 + $0x18] sm:$0xff]  ;;  %s1276_s27 = scalar_lea.vmem [#allocation7], %s730_s22  ;;  %s607_s10 = scalar_lea.hbm %s1382_s3, %s857_s30 }
  0x29   : > { %859 = vmatpush.bf16.msra.mxu2 %v856_v0  ;;  %860 = vmatpush.bf16.msra.mxu3 %v856_v0  ;;  %v851_v5 = vld [vmem:[#allocation5 + $0x10] sm:$0xff]  ;;  %v850_v6 = vld [vmem:[#allocation5 + $0x8] sm:$0xff]  ;;  %v849_v7 = vld [vmem:[#allocation5] sm:$0xff]  ;;  %s608_s24 = sshll.u32 %s1276_s27, 4  ;;  %s610_s15 = sshll.u32 %s607_s10, 4  ;;  %s609_s24 = int_to_ptr.vmem [resolvable:$true] %s608_s24  ;;  %s611_s15 = int_to_ptr.hbm [resolvable:$true] %s610_s15 }
  0x2a   : > { %v833_v8 = vld [vmem:[%s1242_s19] sm:$0xff]  ;;  %v834_v12 = vld [vmem:[%s1242_s19 + $0x8] sm:$0xff]  ;;  %v835_v16 = vld [vmem:[%s1242_s19 + $0x10] sm:$0xff]  ;;  %s595_s25 = scalar_lea.sflag [#allocation4], %s1238_s6  ;;  %s1034_s26 = sshra.s32 %s611_s15, 4  ;;  %s1035_s26 = int_to_ptr.hbm [resolvable:$true] %s1034_s26 }
  0x2b   : > { %v837_v9 = vld [vmem:[%s1242_s19 + $0x20] sm:$0xff]  ;;  %v838_v13 = vld [vmem:[%s1242_s19 + $0x28] sm:$0xff]  ;;  %v839_v17 = vld [vmem:[%s1242_s19 + $0x30] sm:$0xff]  ;;  %s1036_s28 = scalar_lea.hbm %s1035_s26, 256  ;;  %s1040_s9 = scalar_lea.hbm %s1382_s3, 512 }
  0x2c   : > { %442 = vmatpush.bf16.msra.mxu0 %v855_v1  ;;  %861 = vmatpush.bf16.msra.mxu1 %v855_v1  ;;  %v841_v10 = vld [vmem:[%s1242_s19 + $0x40] sm:$0xff]  ;;  %v842_v14 = vld [vmem:[%s1242_s19 + $0x48] sm:$0xff]  ;;  %v843_v18 = vld [vmem:[%s1242_s19 + $0x50] sm:$0xff]  ;;  %p1037_p1 = scmp.ne.s32.totalorder %s1035_s26, %s1036_s28  ;;  %p1041_p10 = scmp.lt.s32.totalorder %s1035_s26, %s1382_s3 }
  0x2d   : > { %862 = vmatpush.bf16.msra.mxu2 %v855_v1  ;;  %863 = vmatpush.bf16.msra.mxu3 %v855_v1  ;;  %v845_v11 = vld [vmem:[%s1242_s19 + $0x60] sm:$0xff]  ;;  %v846_v15 = vld [vmem:[%s1242_s19 + $0x68] sm:$0xff]  ;;  %v847_v19 = vld [vmem:[%s1242_s19 + $0x70] sm:$0xff]  ;;  %p1042_p12 = scmp.lt.s32.totalorder %s1040_s9, %s1036_s28 }
  0x2e   : > { %v836_v20 = vld [vmem:[%s1242_s19 + $0x18] sm:$0xff]  ;;  %v1271_v24 = vld [vmem:[%s1381_s2] ss:$0 sm:$0xff]  ;;  %p1038_p4 = pnand %p1037_p1, %p1215_p5 }
  0x2f   : > { %v840_v21 = vld [vmem:[%s1242_s19 + $0x38] sm:$0xff]  ;;  %p1043_p13 = por %p1042_p12, %p1041_p10 }
  0x30   : > { %443 = vmatpush.bf16.msra.mxu0 %v854_v2  ;;  %864 = vmatpush.bf16.msra.mxu1 %v854_v2  ;;  %v844_v22 = vld [vmem:[%s1242_s19 + $0x58] sm:$0xff]  ;;  %p1039_p8 = pneg %p1038_p4 }
  0x31   : > { %865 = vmatpush.bf16.msra.mxu2 %v854_v2  ;;  %866 = vmatpush.bf16.msra.mxu3 %v854_v2  ;;  %v848_v23 = vld [vmem:[%s1242_s19 + $0x78] sm:$0xff] }
  0x32   : > { %p1044_p0 = pnand %p1043_p13, %p1039_p8 }
  0x34   : > { %444 = vmatpush.bf16.msra.mxu0 %v853_v3  ;;  %867 = vmatpush.bf16.msra.mxu1 %v853_v3 }
  0x35   : > { %868 = vmatpush.bf16.msra.mxu2 %v853_v3  ;;  %869 = vmatpush.bf16.msra.mxu3 %v853_v3 }
  0x38   : > { %445 = vmatpush.bf16.msra.mxu0 %v852_v4  ;;  %870 = vmatpush.bf16.msra.mxu1 %v852_v4 }
  0x39   : > { %871 = vmatpush.bf16.msra.mxu2 %v852_v4  ;;  %872 = vmatpush.bf16.msra.mxu3 %v852_v4 }
  0x3c   : > { %446 = vmatpush.bf16.msra.mxu0 %v851_v5  ;;  %873 = vmatpush.bf16.msra.mxu1 %v851_v5 }
  0x3d   : > { %874 = vmatpush.bf16.msra.mxu2 %v851_v5  ;;  %875 = vmatpush.bf16.msra.mxu3 %v851_v5 }
  0x40   : > { %447 = vmatpush.bf16.msra.mxu0 %v850_v6  ;;  %876 = vmatpush.bf16.msra.mxu1 %v850_v6 }
  0x41   : > { %877 = vmatpush.bf16.msra.mxu2 %v850_v6  ;;  %878 = vmatpush.bf16.msra.mxu3 %v850_v6 }
  0x44   : > { %448 = vmatpush.bf16.msra.mxu0 %v849_v7  ;;  %879 = vmatpush.bf16.msra.mxu1 %v849_v7 }
  0x45   : > { %880 = vmatpush.bf16.msra.mxu2 %v849_v7  ;;  %881 = vmatpush.bf16.msra.mxu3 %v849_v7 }
  0x47   : > { %449 = vmatmul.bf16.vlgmr.msra.gmra.mxu0 %v833_v8  ;;  %469 = vmatmul.bf16.vlgmr.msra.gmra.mxu1 %v837_v9 }
  0x48   : > { %489 = vmatmul.bf16.vlgmr.msra.gmra.mxu2 %v841_v10  ;;  %509 = vmatmul.bf16.vlgmr.msra.gmra.mxu3 %v845_v11 }
  0x57   : > { %454 = vmatmul.bf16.gmra.mxu0 %v834_v12  ;;  %474 = vmatmul.bf16.gmra.mxu1 %v838_v13 }
  0x58   : > { %494 = vmatmul.bf16.gmra.mxu2 %v842_v14  ;;  %514 = vmatmul.bf16.gmra.mxu3 %v846_v15 }
  0x67   : > { %459 = vmatmul.bf16.gmra.mxu0 %v835_v16  ;;  %479 = vmatmul.bf16.gmra.mxu1 %v839_v17 }
  0x68   : > { %499 = vmatmul.bf16.gmra.mxu2 %v843_v18  ;;  %519 = vmatmul.bf16.gmra.mxu3 %v847_v19 }
  0x77   : > { %464 = vmatmul.bf16.gmra.mxu0 %v836_v20  ;;  %484 = vmatmul.bf16.gmra.mxu1 %v840_v21 }
  0x78   : > { %504 = vmatmul.bf16.gmra.mxu2 %v844_v22  ;;  %524 = vmatmul.bf16.gmra.mxu3 %v848_v23 }
  0xc4   : > { %v450_v25 = vpop.f32.mrf.mxu0  ;;  %v470_v26 = vpop.f32.mrf.mxu1 }
  0xc5   : > { %v451_v27 = vadd.f32 %v1271_v24, %v450_v25  ;;  %v471_v28 = vadd.f32 %v1271_v24, %v470_v26 }
  0xc7   : > { %v530_v29 = vmax.f32 %v451_v27, 0.0  ;;  %v538_v30 = vmax.f32 %v471_v28, 0.0 }
  0xc9   : > { %562 = vst [vmem:[%s1276_s27] sm:$0xff] %v530_v29 }
  0xca   : > { %570 = vst [vmem:[%s1276_s27 + $0x40] sm:$0xff] %v538_v30 }
  0xcb   : > { %v490_v31 = vpop.f32.mrf.mxu2  ;;  %v510_v32 = vpop.f32.mrf.mxu3 }
  0xcc   : > { %v491_v33 = vadd.f32 %v1271_v24, %v490_v31  ;;  %v511_v34 = vadd.f32 %v1271_v24, %v510_v32  ;;  %v452_v35 = vpop.f32.mrf.mxu0  ;;  %v472_v36 = vpop.f32.mrf.mxu1 }
  0xcd   : > { %v453_v37 = vadd.f32 %v1271_v24, %v452_v35  ;;  %v473_v38 = vadd.f32 %v1271_v24, %v472_v36 }
  0xce   : > { %v546_v39 = vmax.f32 %v491_v33, 0.0  ;;  %v554_v40 = vmax.f32 %v511_v34, 0.0 }
  0xcf   : > { %v531_v41 = vmax.f32 %v453_v37, 0.0  ;;  %v539_v42 = vmax.f32 %v473_v38, 0.0 }
  0xd0   : > { %578 = vst [vmem:[%s1276_s27 + $0x80] sm:$0xff] %v546_v39 }
  0xd1   : > { %586 = vst [vmem:[%s1276_s27 + $0xc0] sm:$0xff] %v554_v40 }
  0xd2   : > { %563 = vst [vmem:[%s1276_s27 + $0x8] sm:$0xff] %v531_v41 }
  0xd3   : > { %571 = vst [vmem:[%s1276_s27 + $0x48] sm:$0xff] %v539_v42  ;;  %v492_v43 = vpop.f32.mrf.mxu2  ;;  %v512_v44 = vpop.f32.mrf.mxu3 }
  0xd4   : > { %v493_v45 = vadd.f32 %v1271_v24, %v492_v43  ;;  %v513_v46 = vadd.f32 %v1271_v24, %v512_v44  ;;  %v455_v47 = vpop.f32.mrf.mxu0  ;;  %v475_v48 = vpop.f32.mrf.mxu1 }
  0xd5   : > { %v456_v49 = vadd.f32 %v1271_v24, %v455_v47  ;;  %v476_v50 = vadd.f32 %v1271_v24, %v475_v48 }
  0xd6   : > { %v547_v51 = vmax.f32 %v493_v45, 0.0  ;;  %v555_v52 = vmax.f32 %v513_v46, 0.0 }
  0xd7   : > { %v532_v53 = vmax.f32 %v456_v49, 0.0  ;;  %v540_v54 = vmax.f32 %v476_v50, 0.0 }
  0xd8   : > { %579 = vst [vmem:[%s1276_s27 + $0x88] sm:$0xff] %v547_v51 }
  0xd9   : > { %587 = vst [vmem:[%s1276_s27 + $0xc8] sm:$0xff] %v555_v52 }
  0xda   : > { %564 = vst [vmem:[%s1276_s27 + $0x10] sm:$0xff] %v532_v53 }
  0xdb   : > { %572 = vst [vmem:[%s1276_s27 + $0x50] sm:$0xff] %v540_v54  ;;  %v495_v55 = vpop.f32.mrf.mxu2  ;;  %v515_v56 = vpop.f32.mrf.mxu3 }
  0xdc   : > { %v496_v57 = vadd.f32 %v1271_v24, %v495_v55  ;;  %v516_v58 = vadd.f32 %v1271_v24, %v515_v56  ;;  %v457_v59 = vpop.f32.mrf.mxu0  ;;  %v477_v60 = vpop.f32.mrf.mxu1 }
  0xdd   : > { %v458_v61 = vadd.f32 %v1271_v24, %v457_v59  ;;  %v478_v62 = vadd.f32 %v1271_v24, %v477_v60 }
  0xde   : > { %v548_v63 = vmax.f32 %v496_v57, 0.0  ;;  %v556_v0 = vmax.f32 %v516_v58, 0.0 }
  0xdf   : > { %v533_v1 = vmax.f32 %v458_v61, 0.0  ;;  %v541_v2 = vmax.f32 %v478_v62, 0.0 }
  0xe0   : > { %580 = vst [vmem:[%s1276_s27 + $0x90] sm:$0xff] %v548_v63 }
  0xe1   : > { %588 = vst [vmem:[%s1276_s27 + $0xd0] sm:$0xff] %v556_v0 }
  0xe2   : > { %565 = vst [vmem:[%s1276_s27 + $0x18] sm:$0xff] %v533_v1 }
  0xe3   : > { %573 = vst [vmem:[%s1276_s27 + $0x58] sm:$0xff] %v541_v2  ;;  %v497_v3 = vpop.f32.mrf.mxu2  ;;  %v517_v4 = vpop.f32.mrf.mxu3 }
  0xe4   : > { %v498_v5 = vadd.f32 %v1271_v24, %v497_v3  ;;  %v518_v6 = vadd.f32 %v1271_v24, %v517_v4  ;;  %v460_v7 = vpop.f32.mrf.mxu0  ;;  %v480_v8 = vpop.f32.mrf.mxu1 }
  0xe5   : > { %v461_v9 = vadd.f32 %v1271_v24, %v460_v7  ;;  %v481_v10 = vadd.f32 %v1271_v24, %v480_v8 }
  0xe6   : > { %v549_v11 = vmax.f32 %v498_v5, 0.0  ;;  %v557_v12 = vmax.f32 %v518_v6, 0.0 }
  0xe7   : > { %v534_v13 = vmax.f32 %v461_v9, 0.0  ;;  %v542_v14 = vmax.f32 %v481_v10, 0.0 }
  0xe8   : > { %581 = vst [vmem:[%s1276_s27 + $0x98] sm:$0xff] %v549_v11 }
  0xe9   : > { %589 = vst [vmem:[%s1276_s27 + $0xd8] sm:$0xff] %v557_v12 }
  0xea   : > { %566 = vst [vmem:[%s1276_s27 + $0x20] sm:$0xff] %v534_v13 }
  0xeb   : > { %574 = vst [vmem:[%s1276_s27 + $0x60] sm:$0xff] %v542_v14  ;;  %v500_v15 = vpop.f32.mrf.mxu2  ;;  %v520_v16 = vpop.f32.mrf.mxu3 }
  0xec   : > { %v501_v17 = vadd.f32 %v1271_v24, %v500_v15  ;;  %v521_v18 = vadd.f32 %v1271_v24, %v520_v16  ;;  %v462_v19 = vpop.f32.mrf.mxu0  ;;  %v482_v20 = vpop.f32.mrf.mxu1 }
  0xed   : > { %v463_v21 = vadd.f32 %v1271_v24, %v462_v19  ;;  %v483_v22 = vadd.f32 %v1271_v24, %v482_v20 }
  0xee   : > { %v550_v23 = vmax.f32 %v501_v17, 0.0  ;;  %v558_v25 = vmax.f32 %v521_v18, 0.0 }
  0xef   : > { %v535_v26 = vmax.f32 %v463_v21, 0.0  ;;  %v543_v27 = vmax.f32 %v483_v22, 0.0 }
  0xf0   : > { %582 = vst [vmem:[%s1276_s27 + $0xa0] sm:$0xff] %v550_v23 }
  0xf1   : > { %590 = vst [vmem:[%s1276_s27 + $0xe0] sm:$0xff] %v558_v25 }
  0xf2   : > { %567 = vst [vmem:[%s1276_s27 + $0x28] sm:$0xff] %v535_v26 }
  0xf3   : > { %575 = vst [vmem:[%s1276_s27 + $0x68] sm:$0xff] %v543_v27  ;;  %v502_v28 = vpop.f32.mrf.mxu2  ;;  %v522_v29 = vpop.f32.mrf.mxu3 }
  0xf4   : > { %v503_v30 = vadd.f32 %v1271_v24, %v502_v28  ;;  %v523_v31 = vadd.f32 %v1271_v24, %v522_v29  ;;  %v465_v32 = vpop.f32.mrf.mxu0  ;;  %v485_v33 = vpop.f32.mrf.mxu1 }
  0xf5   : > { %v466_v34 = vadd.f32 %v1271_v24, %v465_v32  ;;  %v486_v35 = vadd.f32 %v1271_v24, %v485_v33 }
  0xf6   : > { %v551_v36 = vmax.f32 %v503_v30, 0.0  ;;  %v559_v37 = vmax.f32 %v523_v31, 0.0 }
  0xf7   : > { %v536_v38 = vmax.f32 %v466_v34, 0.0  ;;  %v544_v39 = vmax.f32 %v486_v35, 0.0 }
  0xf8   : > { %583 = vst [vmem:[%s1276_s27 + $0xa8] sm:$0xff] %v551_v36 }
  0xf9   : > { %591 = vst [vmem:[%s1276_s27 + $0xe8] sm:$0xff] %v559_v37 }
  0xfa   : > { %568 = vst [vmem:[%s1276_s27 + $0x30] sm:$0xff] %v536_v38 }
  0xfb   : > { %576 = vst [vmem:[%s1276_s27 + $0x70] sm:$0xff] %v544_v39  ;;  %v505_v40 = vpop.f32.mrf.mxu2  ;;  %v525_v41 = vpop.f32.mrf.mxu3 }
  0xfc   : > { %v506_v42 = vadd.f32 %v1271_v24, %v505_v40  ;;  %v526_v43 = vadd.f32 %v1271_v24, %v525_v41  ;;  %v467_v44 = vpop.f32.mrf.mxu0  ;;  %v487_v45 = vpop.f32.mrf.mxu1 }
  0xfd   : > { %v468_v46 = vadd.f32 %v1271_v24, %v467_v44  ;;  %v488_v47 = vadd.f32 %v1271_v24, %v487_v45 }
  0xfe   : > { %v552_v48 = vmax.f32 %v506_v42, 0.0  ;;  %v560_v49 = vmax.f32 %v526_v43, 0.0 }
  0xff   : > { %v537_v50 = vmax.f32 %v468_v46, 0.0  ;;  %v545_v51 = vmax.f32 %v488_v47, 0.0 }
 0x100   : > { %584 = vst [vmem:[%s1276_s27 + $0xb0] sm:$0xff] %v552_v48 }
 0x101   : > { %592 = vst [vmem:[%s1276_s27 + $0xf0] sm:$0xff] %v560_v49 }
 0x102   : > { %569 = vst [vmem:[%s1276_s27 + $0x38] sm:$0xff] %v537_v50 }
 0x103   : > { %577 = vst [vmem:[%s1276_s27 + $0x78] sm:$0xff] %v545_v51  ;;  %v507_v52 = vpop.f32.mrf.mxu2  ;;  %v527_v53 = vpop.f32.mrf.mxu3 }
 0x104   : > { %v508_v54 = vadd.f32 %v1271_v24, %v507_v52  ;;  %v528_v55 = vadd.f32 %v1271_v24, %v527_v53 }
 0x106   : > { %v553_v56 = vmax.f32 %v508_v54, 0.0  ;;  %v561_v57 = vmax.f32 %v528_v55, 0.0 }
 0x108   : > { %585 = vst [vmem:[%s1276_s27 + $0xb8] sm:$0xff] %v553_v56 }
 0x109   : > { %593 = vst [vmem:[%s1276_s27 + $0xf8] sm:$0xff] %v561_v57 }
 0x10a   : > { %1047 = shalt.err (!%p1044_p0)
}
 0x10b   : > { %s1111_s6 = smov 128   ;;  %s1112_s1 = smov 8  }
 0x10c   : > { %888 = dma.vmem_to_hbm [thread:$0]  (%p1215_p5), %s609_s24, 4096, %s611_s15, %s595_s25, %s1111_s6, %s1111_s6, %s1112_s1  }
 0x10d PF: > { %s625_s20 = sand.u32 1, %s1086_s12   ;;  %p899_p3 = pnand %p723_p11, %p1182_p6 }
 0x10e   : > { %s626_s22 = scalar_lea.sflag [#allocation4], %s625_s20 }
 0x10f   : > { %p900_p7 = pneg %p899_p3 }
 0x111   : > { %1081 = dma.done.wait (%p900_p7), %s626_s22, 4096  }
 0x112   : > { %1083 = vsyncadd (%p900_p7), %s626_s22, 4294963200  ;;  %s20_s17 = sadd.s32 1, %s1106_s17   ;;  %s1394_s12 = smov %s1090_s13 }
 0x113   : > { %p17_p9 = scmp.ge.s32.totalorder %s20_s17, 4   ;;  %s1395_s13 = smov %s1094_s14 }
 0x114   : > { %s1396_s14 = smov %s1224_s18  ;;  %s1397_s15 = smov %s1102_s16 }
 0x115   : > { %s1398_s16 = smov %s1400_s5  ;;  %19 = sbr.rel (!%p17_p9) target bundleno = 9 (0x9), region = 85 }
 0x11a   :  { %632 = vsyncpa [#allocation3], 1 }
 0x11b   :  { %634 = vsyncpa [#allocation3 + $0x1], 1 }
 0x11c   :  { %635 = vsyncpa [#allocation6], 1 }
 0x11d   :  { %636 = vsyncpa [#allocation4], 1 }
 0x11e   :  { %638 = vsyncpa [#allocation4 + $0x1], 1 }

</bundles_post_ra>
